<compile_context>
chip_gen: v6e
topology: v6e:2x2x1
jax: 0.10.0
libtpu: 0.0.40
codegen_flags: <defaults>
</compile_context>

<pallas_src>
import jax
import jax.numpy as jnp
from jax import lax
from jax.experimental import pallas as pl
from jax.experimental.pallas import tpu as pltpu


# ----------------------------------------------------------------------------
# Fused kernel (one image per grid step; activations live as (C, H*W) in VMEM)
# ----------------------------------------------------------------------------
def _make_rdb_kernel(H, W, C0, GC):
    HW = H * W

    def kernel(x_ref,
               w1_ref, b1_ref, w2_ref, b2_ref, w3_ref, b3_ref,
               w4_ref, b4_ref, w5_ref, b5_ref,
               o_ref, col_ref):
        # Column coordinate of every flattened spatial position; used to zero
        # the dx = -1 / +1 contributions that would wrap across image rows.
        lane = lax.broadcasted_iota(jnp.int32, (1, HW), 1)
        xcoord = lane % W
        mask_l = xcoord >= 1          # dx = -1 contribution valid
        mask_r = xcoord <= W - 2      # dx = +1 contribution valid

        def im2col_write(act, ch_off):
            # Write the 3 vertically shifted (dy = -1, 0, +1) copies of `act`
            # (c channels) into the shared scratch rows [3*ch_off, 3*(ch_off+c)).
            # Vertical shifts are whole-row shifts of the flat axis, so the
            # zero fill alone handles the top/bottom padding (no masking).
            c = act.shape[0]
            base = 3 * ch_off
            zrow = jnp.zeros((c, W), jnp.float32)
            col_ref[base + 0 * c: base + 1 * c, :] = jnp.concatenate(
                [zrow, act[:, :HW - W]], axis=1)            # dy = -1 (kh = 0)
            col_ref[base + 1 * c: base + 2 * c, :] = act    # dy =  0 (kh = 1)
            col_ref[base + 2 * c: base + 3 * c, :] = jnp.concatenate(
                [act[:, W:], zrow], axis=1)                 # dy = +1 (kh = 2)

        def conv(w_ref, b_ref, cin, cout, lrelu):
            patches = col_ref[0: 3 * cin, :]                       # (3*cin, HW)
            z = jnp.dot(w_ref[...], patches,
                        preferred_element_type=jnp.float32)        # (3*cout, HW)
            z_m1 = z[0 * cout:1 * cout, :]    # dx = -1 taps (kw = 0)
            z_c = z[1 * cout:2 * cout, :]     # dx =  0 taps (kw = 1)
            z_p1 = z[2 * cout:3 * cout, :]    # dx = +1 taps (kw = 2)
            zcol = jnp.zeros((cout, 1), jnp.float32)
            # y[p] += z_m1[p-1] (if col >= 1) + z_p1[p+1] (if col <= W-2)
            left = jnp.concatenate([zcol, z_m1[:, :HW - 1]], axis=1)
            right = jnp.concatenate([z_p1[:, 1:], zcol], axis=1)
            y = (z_c
                 + jnp.where(mask_l, left, 0.0)
                 + jnp.where(mask_r, right, 0.0)
                 + b_ref[...])
            if lrelu:
                y = jnp.maximum(y, 0.2 * y)   # LeakyReLU(0.2)
            return y

        x = x_ref[0].astype(jnp.float32)                           # (C0, HW)
        im2col_write(x, 0)
        x1 = conv(w1_ref, b1_ref, C0, GC, True)
        im2col_write(x1, C0)
        x2 = conv(w2_ref, b2_ref, C0 + GC, GC, True)
        im2col_write(x2, C0 + GC)
        x3 = conv(w3_ref, b3_ref, C0 + 2 * GC, GC, True)
        im2col_write(x3, C0 + 2 * GC)
        x4 = conv(w4_ref, b4_ref, C0 + 3 * GC, GC, True)
        im2col_write(x4, C0 + 3 * GC)
        x5 = conv(w5_ref, b5_ref, C0 + 4 * GC, C0, False)
        o_ref[0] = (x5 * 0.2 + x).astype(o_ref.dtype)

    return kernel


# ----------------------------------------------------------------------------
# Host-side weight packing: (Cout, Cin, 3, 3) -> (3*Cout, 3*Cin).
# Row blocks are the 3 horizontal taps (kw = 0, 1, 2).  Columns match the
# im2col scratch row order: stages consecutive, kh-major / channel-minor
# within each stage.
# ----------------------------------------------------------------------------
def _pack_weight(w_oihw, stage_sizes):
    cout, cin = w_oihw.shape[:2]
    parts = []
    off = 0
    for cs in stage_sizes:
        wj = w_oihw[:, off:off + cs, :, :]            # (Cout, cs, kh, kw)
        wj = jnp.transpose(wj, (3, 0, 2, 1))          # (kw, Cout, kh, cs)
        parts.append(wj.reshape(3, cout, 3 * cs))     # cols: kh-major, ch-minor
        off += cs
    assert off == cin
    w_cols = jnp.concatenate(parts, axis=2)           # (3, Cout, 3*Cin)
    return w_cols.reshape(3 * cout, 3 * cin)          # rows: kw-major, Cout-minor


# ----------------------------------------------------------------------------
# Public wrapper (NCHW in / NCHW out, matching PyTorch)
# ----------------------------------------------------------------------------
@jax.jit
def residual_dense_block(x_nchw, params):
    N, C0, H, W = x_nchw.shape
    GC = params["w1"].shape[0]          # num_grow_ch
    HW = H * W
    x_flat = x_nchw.reshape(N, C0, HW)  # free reshape, already lane-dense

    args = [x_flat]
    in_specs = [pl.BlockSpec((1, C0, HW), lambda n: (n, 0, 0))]
    for k in range(1, 6):
        w = params[f"w{k}"]             # (Cout, Cin, 3, 3)
        b = params[f"b{k}"]             # (Cout,)
        cout, cin = w.shape[:2]
        stage_sizes = [C0] + [GC] * (k - 1)
        args.append(_pack_weight(w, stage_sizes))
        args.append(b.reshape(cout, 1))
        in_specs.append(pl.BlockSpec((3 * cout, 3 * cin), lambda n: (0, 0)))
        in_specs.append(pl.BlockSpec((cout, 1), lambda n: (0, 0)))

    c_total = C0 + 4 * GC
    kernel = _make_rdb_kernel(H, W, C0, GC)

    out = pl.pallas_call(
        kernel,
        out_shape=jax.ShapeDtypeStruct((N, C0, HW), x_nchw.dtype),
        grid_spec=pltpu.PrefetchScalarGridSpec(
            num_scalar_prefetch=0,
            grid=(N,),
            in_specs=in_specs,
            out_specs=pl.BlockSpec((1, C0, HW), lambda n: (n, 0, 0)),
            scratch_shapes=[pltpu.VMEM((3 * c_total, HW), jnp.float32)],
        ),
        compiler_params=pltpu.CompilerParams(
            dimension_semantics=("parallel",),  # v7x: one image per TensorCore
        ),
    )(*args)
    return out.reshape(N, C0, H, W)


# ----------------------------------------------------------------------------
# Parameter init (OIHW, PyTorch layout) — kaiming-normal-ish * scale
# ----------------------------------------------------------------------------
def init_rdb_params(key, num_feat=8, num_grow_ch=4, scale=0.1):
    chans = [
        (num_feat, num_grow_ch),
        (num_feat + num_grow_ch, num_grow_ch),
        (num_feat + 2 * num_grow_ch, num_grow_ch),
        (num_feat + 3 * num_grow_ch, num_grow_ch),
        (num_feat + 4 * num_grow_ch, num_feat),
    ]
    params = {}
    for i, (cin, cout) in enumerate(chans, start=1):
        key, wk, bk = jax.random.split(key, 3)
        fan_in = cin * 9
        std = (2.0 / fan_in) ** 0.5 * scale
        params[f"w{i}"] = jax.random.normal(wk, (cout, cin, 3, 3), jnp.float32) * std
        params[f"b{i}"] = jax.random.normal(bk, (cout,), jnp.float32) * 0.1
    return params


# ----------------------------------------------------------------------------
# Pure-JAX reference (correctness check only)
# ----------------------------------------------------------------------------
def _conv_ref(x, w, b):
    y = lax.conv_general_dilated(
        x, w, window_strides=(1, 1), padding=((1, 1), (1, 1)),
        dimension_numbers=("NCHW", "OIHW", "NCHW"))
    return y + b[None, :, None, None]


def _lrelu(x):
    return jnp.where(x >= 0, x, 0.2 * x)


def residual_dense_block_ref(x, p):
    x1 = _lrelu(_conv_ref(x, p["w1"], p["b1"]))
    x2 = _lrelu(_conv_ref(jnp.concatenate([x, x1], 1), p["w2"], p["b2"]))
    x3 = _lrelu(_conv_ref(jnp.concatenate([x, x1, x2], 1), p["w3"], p["b3"]))
    x4 = _lrelu(_conv_ref(jnp.concatenate([x, x1, x2, x3], 1), p["w4"], p["b4"]))
    x5 = _conv_ref(jnp.concatenate([x, x1, x2, x3, x4], 1), p["w5"], p["b5"])
    return x5 * 0.2 + x


if __name__ == "__main__":
    key = jax.random.PRNGKey(0)
    kx, kp = jax.random.split(key)

    N, num_feat, num_grow_ch, H, W = 2, 8, 4, 16, 16
    x = jax.random.normal(kx, (N, num_feat, H, W), dtype=jnp.float32)
    params = init_rdb_params(kp, num_feat=num_feat, num_grow_ch=num_grow_ch, scale=0.1)

    out = jax.block_until_ready(residual_dense_block(x, params))
    ref = jax.block_until_ready(residual_dense_block_ref(x, params))

    assert out.shape == (N, num_feat, H, W)
    assert jnp.allclose(out, ref, atol=1e-4, rtol=1e-4), "mismatch vs reference"

    print("KERNEL_OK")
</pallas_src>

<mosaic_0001>
module attributes {stable_mosaic.version = 11 : i64} {
  func.func @kernel(%arg0: i32, %arg1: memref<1x8x256xf32, #tpu.memory_space<vmem>>, %arg2: memref<12x24xf32, #tpu.memory_space<vmem>>, %arg3: memref<4x1xf32, #tpu.memory_space<vmem>>, %arg4: memref<12x36xf32, #tpu.memory_space<vmem>>, %arg5: memref<4x1xf32, #tpu.memory_space<vmem>>, %arg6: memref<12x48xf32, #tpu.memory_space<vmem>>, %arg7: memref<4x1xf32, #tpu.memory_space<vmem>>, %arg8: memref<12x60xf32, #tpu.memory_space<vmem>>, %arg9: memref<4x1xf32, #tpu.memory_space<vmem>>, %arg10: memref<24x72xf32, #tpu.memory_space<vmem>>, %arg11: memref<8x1xf32, #tpu.memory_space<vmem>>, %arg12: memref<1x8x256xf32, #tpu.memory_space<vmem>>, %arg13: memref<72x256xf32, #tpu.memory_space<vmem>>) attributes {dimension_semantics = [#tpu.dimension_semantics<parallel>], iteration_bounds = array<i64: 2>, scalar_prefetch = 0 : i64, scratch_operands = 1 : i64, tpu.core_type = #tpu.core_type<tc>, window_params = [{transform_indices = @transform_0, window_bounds = array<i64: 1, 8, 256>}, {pipeline_mode = #tpu.pipeline_mode<synchronous>, transform_indices = @transform_1, window_bounds = array<i64: 12, 24>}, {pipeline_mode = #tpu.pipeline_mode<synchronous>, transform_indices = @transform_2, window_bounds = array<i64: 4, 1>}, {pipeline_mode = #tpu.pipeline_mode<synchronous>, transform_indices = @transform_3, window_bounds = array<i64: 12, 36>}, {pipeline_mode = #tpu.pipeline_mode<synchronous>, transform_indices = @transform_4, window_bounds = array<i64: 4, 1>}, {pipeline_mode = #tpu.pipeline_mode<synchronous>, transform_indices = @transform_5, window_bounds = array<i64: 12, 48>}, {pipeline_mode = #tpu.pipeline_mode<synchronous>, transform_indices = @transform_6, window_bounds = array<i64: 4, 1>}, {pipeline_mode = #tpu.pipeline_mode<synchronous>, transform_indices = @transform_7, window_bounds = array<i64: 12, 60>}, {pipeline_mode = #tpu.pipeline_mode<synchronous>, transform_indices = @transform_8, window_bounds = array<i64: 4, 1>}, {pipeline_mode = #tpu.pipeline_mode<synchronous>, transform_indices = @transform_9, window_bounds = array<i64: 24, 72>}, {pipeline_mode = #tpu.pipeline_mode<synchronous>, transform_indices = @transform_10, window_bounds = array<i64: 8, 1>}, {transform_indices = @transform_11, window_bounds = array<i64: 1, 8, 256>}]} {
    %0 = tpu.iota {dimensions = array<i32: 1>} : vector<1x256xi32>
    %c16_i32 = arith.constant 16 : i32
    %c0_i32 = arith.constant 0 : i32
    %1 = arith.cmpi eq, %c16_i32, %c0_i32 : i32
    %c1_i32 = arith.constant 1 : i32
    %2 = arith.select %1, %c1_i32, %c16_i32 : i32
    %3 = vector.broadcast %2 : i32 to vector<1x256xi32>
    %4 = arith.remsi %0, %3 : vector<1x256xi32>
    %c0_i32_0 = arith.constant 0 : i32
    %5 = vector.broadcast %c0_i32_0 : i32 to vector<1x256xi32>
    %6 = arith.cmpi ne, %4, %5 : vector<1x256xi32>
    %c0_i32_1 = arith.constant 0 : i32
    %7 = vector.broadcast %c0_i32_1 : i32 to vector<1x256xi32>
    %8 = arith.cmpi slt, %4, %7 : vector<1x256xi32>
    %c0_i32_2 = arith.constant 0 : i32
    %9 = arith.cmpi slt, %2, %c0_i32_2 : i32
    %10 = vector.broadcast %9 : i1 to vector<1x256xi1>
    %11 = vector.broadcast %10 : vector<1x256xi1> to vector<1x256xi1>
    %12 = arith.xori %8, %11 : vector<1x256xi1>
    %13 = arith.andi %12, %6 : vector<1x256xi1>
    %14 = vector.broadcast %2 : i32 to vector<1x256xi32>
    %15 = arith.addi %4, %14 : vector<1x256xi32>
    %16 = arith.select %13, %15, %4 : vector<1x256xi1>, vector<1x256xi32>
    %c1_i32_3 = arith.constant 1 : i32
    %17 = vector.broadcast %c1_i32_3 : i32 to vector<1x256xi32>
    %18 = arith.cmpi sge, %16, %17 : vector<1x256xi32>
    %c14_i32 = arith.constant 14 : i32
    %19 = vector.broadcast %c14_i32 : i32 to vector<1x256xi32>
    %20 = arith.cmpi sle, %16, %19 : vector<1x256xi32>
    %c0 = arith.constant 0 : index
    %c0_4 = arith.constant 0 : index
    %c0_5 = arith.constant 0 : index
    %21 = vector.load %arg1[%c0, %c0_4, %c0_5] : memref<1x8x256xf32, #tpu.memory_space<vmem>>, vector<1x8x256xf32>
    %22 = vector.shape_cast %21 : vector<1x8x256xf32> to vector<8x256xf32>
    %cst = arith.constant 0.000000e+00 : f32
    %23 = vector.broadcast %cst : f32 to vector<8x16xf32>
    %24 = vector.extract_strided_slice %22 {offsets = [0, 0], sizes = [8, 240], strides = [1, 1]} : vector<8x256xf32> to vector<8x240xf32>
    %25 = tpu.concatenate %23, %24 in 1 : vector<8x16xf32>, vector<8x240xf32> -> vector<8x256xf32>
    %c0_6 = arith.constant 0 : index
    %c0_7 = arith.constant 0 : index
    %26 = vector.load %arg13[%c0_6, %c0_7] : memref<72x256xf32, #tpu.memory_space<vmem>>, vector<8x256xf32>
    tpu.vector_store %arg13[%c0_6, %c0_7], %25 {strides = array<i32>} : memref<72x256xf32, #tpu.memory_space<vmem>>, vector<8x256xf32>,
    %c8 = arith.constant 8 : index
    %c0_8 = arith.constant 0 : index
    %27 = vector.load %arg13[%c8, %c0_8] : memref<72x256xf32, #tpu.memory_space<vmem>>, vector<8x256xf32>
    tpu.vector_store %arg13[%c8, %c0_8], %22 {strides = array<i32>} : memref<72x256xf32, #tpu.memory_space<vmem>>, vector<8x256xf32>,
    %28 = vector.extract_strided_slice %22 {offsets = [0, 16], sizes = [8, 240], strides = [1, 1]} : vector<8x256xf32> to vector<8x240xf32>
    %29 = tpu.concatenate %28, %23 in 1 : vector<8x240xf32>, vector<8x16xf32> -> vector<8x256xf32>
    %c16 = arith.constant 16 : index
    %c0_9 = arith.constant 0 : index
    %30 = vector.load %arg13[%c16, %c0_9] : memref<72x256xf32, #tpu.memory_space<vmem>>, vector<8x256xf32>
    tpu.vector_store %arg13[%c16, %c0_9], %29 {strides = array<i32>} : memref<72x256xf32, #tpu.memory_space<vmem>>, vector<8x256xf32>,
    %c0_10 = arith.constant 0 : index
    %c0_11 = arith.constant 0 : index
    %31 = vector.load %arg13[%c0_10, %c0_11] : memref<72x256xf32, #tpu.memory_space<vmem>>, vector<24x256xf32>
    %c0_12 = arith.constant 0 : index
    %c0_13 = arith.constant 0 : index
    %32 = vector.load %arg2[%c0_12, %c0_13] : memref<12x24xf32, #tpu.memory_space<vmem>>, vector<12x24xf32>
    %cst_14 = arith.constant dense<0.000000e+00> : vector<12x256xf32>
    %33 = tpu.matmul %32, %31, %cst_14 {dimension_numbers = #tpu.dot_dimension_numbers<[1], [0], [0], [1], [0, 0, 1, 1], [], []>} : vector<12x24xf32>, vector<24x256xf32>, vector<12x256xf32> -> vector<12x256xf32>
    %34 = vector.extract_strided_slice %33 {offsets = [0, 0], sizes = [4, 256], strides = [1, 1]} : vector<12x256xf32> to vector<4x256xf32>
    %35 = vector.extract_strided_slice %33 {offsets = [4, 0], sizes = [4, 256], strides = [1, 1]} : vector<12x256xf32> to vector<4x256xf32>
    %36 = vector.extract_strided_slice %33 {offsets = [8, 0], sizes = [4, 256], strides = [1, 1]} : vector<12x256xf32> to vector<4x256xf32>
    %cst_15 = arith.constant 0.000000e+00 : f32
    %37 = vector.broadcast %cst_15 : f32 to vector<4x1xf32>
    %38 = vector.extract_strided_slice %34 {offsets = [0, 0], sizes = [4, 255], strides = [1, 1]} : vector<4x256xf32> to vector<4x255xf32>
    %39 = tpu.concatenate %37, %38 in 1 : vector<4x1xf32>, vector<4x255xf32> -> vector<4x256xf32>
    %40 = vector.extract_strided_slice %36 {offsets = [0, 1], sizes = [4, 255], strides = [1, 1]} : vector<4x256xf32> to vector<4x255xf32>
    %41 = tpu.concatenate %40, %37 in 1 : vector<4x255xf32>, vector<4x1xf32> -> vector<4x256xf32>
    %cst_16 = arith.constant 0.000000e+00 : f32
    %42 = vector.shape_cast %18 : vector<1x256xi1> to vector<1x256xi1>
    %43 = vector.broadcast %42 : vector<1x256xi1> to vector<4x256xi1>
    %44 = vector.broadcast %cst_16 : f32 to vector<4x256xf32>
    %45 = arith.select %43, %39, %44 : vector<4x256xi1>, vector<4x256xf32>
    %46 = arith.addf %35, %45 : vector<4x256xf32>
    %cst_17 = arith.constant 0.000000e+00 : f32
    %47 = vector.shape_cast %20 : vector<1x256xi1> to vector<1x256xi1>
    %48 = vector.broadcast %47 : vector<1x256xi1> to vector<4x256xi1>
    %49 = vector.broadcast %cst_17 : f32 to vector<4x256xf32>
    %50 = arith.select %48, %41, %49 : vector<4x256xi1>, vector<4x256xf32>
    %51 = arith.addf %46, %50 : vector<4x256xf32>
    %c0_18 = arith.constant 0 : index
    %c0_19 = arith.constant 0 : index
    %52 = vector.load %arg3[%c0_18, %c0_19] : memref<4x1xf32, #tpu.memory_space<vmem>>, vector<4x1xf32>
    %53 = vector.broadcast %52 : vector<4x1xf32> to vector<4x256xf32>
    %54 = arith.addf %51, %53 : vector<4x256xf32>
    %cst_20 = arith.constant 2.000000e-01 : f32
    %55 = vector.broadcast %cst_20 : f32 to vector<4x256xf32>
    %56 = arith.mulf %55, %54 : vector<4x256xf32>
    %57 = arith.maximumf %54, %56 : vector<4x256xf32>
    %cst_21 = arith.constant 0.000000e+00 : f32
    %58 = vector.broadcast %cst_21 : f32 to vector<4x16xf32>
    %59 = vector.extract_strided_slice %57 {offsets = [0, 0], sizes = [4, 240], strides = [1, 1]} : vector<4x256xf32> to vector<4x240xf32>
    %60 = tpu.concatenate %58, %59 in 1 : vector<4x16xf32>, vector<4x240xf32> -> vector<4x256xf32>
    %c24 = arith.constant 24 : index
    %c0_22 = arith.constant 0 : index
    %61 = vector.load %arg13[%c24, %c0_22] : memref<72x256xf32, #tpu.memory_space<vmem>>, vector<4x256xf32>
    tpu.vector_store %arg13[%c24, %c0_22], %60 {strides = array<i32>} : memref<72x256xf32, #tpu.memory_space<vmem>>, vector<4x256xf32>,
    %c28 = arith.constant 28 : index
    %c0_23 = arith.constant 0 : index
    %62 = vector.load %arg13[%c28, %c0_23] : memref<72x256xf32, #tpu.memory_space<vmem>>, vector<4x256xf32>
    tpu.vector_store %arg13[%c28, %c0_23], %57 {strides = array<i32>} : memref<72x256xf32, #tpu.memory_space<vmem>>, vector<4x256xf32>,
    %63 = vector.extract_strided_slice %57 {offsets = [0, 16], sizes = [4, 240], strides = [1, 1]} : vector<4x256xf32> to vector<4x240xf32>
    %64 = tpu.concatenate %63, %58 in 1 : vector<4x240xf32>, vector<4x16xf32> -> vector<4x256xf32>
    %c32 = arith.constant 32 : index
    %c0_24 = arith.constant 0 : index
    %65 = vector.load %arg13[%c32, %c0_24] : memref<72x256xf32, #tpu.memory_space<vmem>>, vector<4x256xf32>
    tpu.vector_store %arg13[%c32, %c0_24], %64 {strides = array<i32>} : memref<72x256xf32, #tpu.memory_space<vmem>>, vector<4x256xf32>,
    %c0_25 = arith.constant 0 : index
    %c0_26 = arith.constant 0 : index
    %66 = vector.load %arg13[%c0_25, %c0_26] : memref<72x256xf32, #tpu.memory_space<vmem>>, vector<36x256xf32>
    %c0_27 = arith.constant 0 : index
    %c0_28 = arith.constant 0 : index
    %67 = vector.load %arg4[%c0_27, %c0_28] : memref<12x36xf32, #tpu.memory_space<vmem>>, vector<12x36xf32>
    %cst_29 = arith.constant dense<0.000000e+00> : vector<12x256xf32>
    %68 = tpu.matmul %67, %66, %cst_29 {dimension_numbers = #tpu.dot_dimension_numbers<[1], [0], [0], [1], [0, 0, 1, 1], [], []>} : vector<12x36xf32>, vector<36x256xf32>, vector<12x256xf32> -> vector<12x256xf32>
    %69 = vector.extract_strided_slice %68 {offsets = [0, 0], sizes = [4, 256], strides = [1, 1]} : vector<12x256xf32> to vector<4x256xf32>
    %70 = vector.extract_strided_slice %68 {offsets = [4, 0], sizes = [4, 256], strides = [1, 1]} : vector<12x256xf32> to vector<4x256xf32>
    %71 = vector.extract_strided_slice %68 {offsets = [8, 0], sizes = [4, 256], strides = [1, 1]} : vector<12x256xf32> to vector<4x256xf32>
    %cst_30 = arith.constant 0.000000e+00 : f32
    %72 = vector.broadcast %cst_30 : f32 to vector<4x1xf32>
    %73 = vector.extract_strided_slice %69 {offsets = [0, 0], sizes = [4, 255], strides = [1, 1]} : vector<4x256xf32> to vector<4x255xf32>
    %74 = tpu.concatenate %72, %73 in 1 : vector<4x1xf32>, vector<4x255xf32> -> vector<4x256xf32>
    %75 = vector.extract_strided_slice %71 {offsets = [0, 1], sizes = [4, 255], strides = [1, 1]} : vector<4x256xf32> to vector<4x255xf32>
    %76 = tpu.concatenate %75, %72 in 1 : vector<4x255xf32>, vector<4x1xf32> -> vector<4x256xf32>
    %cst_31 = arith.constant 0.000000e+00 : f32
    %77 = vector.shape_cast %18 : vector<1x256xi1> to vector<1x256xi1>
    %78 = vector.broadcast %77 : vector<1x256xi1> to vector<4x256xi1>
    %79 = vector.broadcast %cst_31 : f32 to vector<4x256xf32>
    %80 = arith.select %78, %74, %79 : vector<4x256xi1>, vector<4x256xf32>
    %81 = arith.addf %70, %80 : vector<4x256xf32>
    %cst_32 = arith.constant 0.000000e+00 : f32
    %82 = vector.shape_cast %20 : vector<1x256xi1> to vector<1x256xi1>
    %83 = vector.broadcast %82 : vector<1x256xi1> to vector<4x256xi1>
    %84 = vector.broadcast %cst_32 : f32 to vector<4x256xf32>
    %85 = arith.select %83, %76, %84 : vector<4x256xi1>, vector<4x256xf32>
    %86 = arith.addf %81, %85 : vector<4x256xf32>
    %c0_33 = arith.constant 0 : index
    %c0_34 = arith.constant 0 : index
    %87 = vector.load %arg5[%c0_33, %c0_34] : memref<4x1xf32, #tpu.memory_space<vmem>>, vector<4x1xf32>
    %88 = vector.broadcast %87 : vector<4x1xf32> to vector<4x256xf32>
    %89 = arith.addf %86, %88 : vector<4x256xf32>
    %cst_35 = arith.constant 2.000000e-01 : f32
    %90 = vector.broadcast %cst_35 : f32 to vector<4x256xf32>
    %91 = arith.mulf %90, %89 : vector<4x256xf32>
    %92 = arith.maximumf %89, %91 : vector<4x256xf32>
    %cst_36 = arith.constant 0.000000e+00 : f32
    %93 = vector.broadcast %cst_36 : f32 to vector<4x16xf32>
    %94 = vector.extract_strided_slice %92 {offsets = [0, 0], sizes = [4, 240], strides = [1, 1]} : vector<4x256xf32> to vector<4x240xf32>
    %95 = tpu.concatenate %93, %94 in 1 : vector<4x16xf32>, vector<4x240xf32> -> vector<4x256xf32>
    %c36 = arith.constant 36 : index
    %c0_37 = arith.constant 0 : index
    %96 = vector.load %arg13[%c36, %c0_37] : memref<72x256xf32, #tpu.memory_space<vmem>>, vector<4x256xf32>
    tpu.vector_store %arg13[%c36, %c0_37], %95 {strides = array<i32>} : memref<72x256xf32, #tpu.memory_space<vmem>>, vector<4x256xf32>,
    %c40 = arith.constant 40 : index
    %c0_38 = arith.constant 0 : index
    %97 = vector.load %arg13[%c40, %c0_38] : memref<72x256xf32, #tpu.memory_space<vmem>>, vector<4x256xf32>
    tpu.vector_store %arg13[%c40, %c0_38], %92 {strides = array<i32>} : memref<72x256xf32, #tpu.memory_space<vmem>>, vector<4x256xf32>,
    %98 = vector.extract_strided_slice %92 {offsets = [0, 16], sizes = [4, 240], strides = [1, 1]} : vector<4x256xf32> to vector<4x240xf32>
    %99 = tpu.concatenate %98, %93 in 1 : vector<4x240xf32>, vector<4x16xf32> -> vector<4x256xf32>
    %c44 = arith.constant 44 : index
    %c0_39 = arith.constant 0 : index
    %100 = vector.load %arg13[%c44, %c0_39] : memref<72x256xf32, #tpu.memory_space<vmem>>, vector<4x256xf32>
    tpu.vector_store %arg13[%c44, %c0_39], %99 {strides = array<i32>} : memref<72x256xf32, #tpu.memory_space<vmem>>, vector<4x256xf32>,
    %c0_40 = arith.constant 0 : index
    %c0_41 = arith.constant 0 : index
    %101 = vector.load %arg13[%c0_40, %c0_41] : memref<72x256xf32, #tpu.memory_space<vmem>>, vector<48x256xf32>
    %c0_42 = arith.constant 0 : index
    %c0_43 = arith.constant 0 : index
    %102 = vector.load %arg6[%c0_42, %c0_43] : memref<12x48xf32, #tpu.memory_space<vmem>>, vector<12x48xf32>
    %cst_44 = arith.constant dense<0.000000e+00> : vector<12x256xf32>
    %103 = tpu.matmul %102, %101, %cst_44 {dimension_numbers = #tpu.dot_dimension_numbers<[1], [0], [0], [1], [0, 0, 1, 1], [], []>} : vector<12x48xf32>, vector<48x256xf32>, vector<12x256xf32> -> vector<12x256xf32>
    %104 = vector.extract_strided_slice %103 {offsets = [0, 0], sizes = [4, 256], strides = [1, 1]} : vector<12x256xf32> to vector<4x256xf32>
    %105 = vector.extract_strided_slice %103 {offsets = [4, 0], sizes = [4, 256], strides = [1, 1]} : vector<12x256xf32> to vector<4x256xf32>
    %106 = vector.extract_strided_slice %103 {offsets = [8, 0], sizes = [4, 256], strides = [1, 1]} : vector<12x256xf32> to vector<4x256xf32>
    %cst_45 = arith.constant 0.000000e+00 : f32
    %107 = vector.broadcast %cst_45 : f32 to vector<4x1xf32>
    %108 = vector.extract_strided_slice %104 {offsets = [0, 0], sizes = [4, 255], strides = [1, 1]} : vector<4x256xf32> to vector<4x255xf32>
    %109 = tpu.concatenate %107, %108 in 1 : vector<4x1xf32>, vector<4x255xf32> -> vector<4x256xf32>
    %110 = vector.extract_strided_slice %106 {offsets = [0, 1], sizes = [4, 255], strides = [1, 1]} : vector<4x256xf32> to vector<4x255xf32>
    %111 = tpu.concatenate %110, %107 in 1 : vector<4x255xf32>, vector<4x1xf32> -> vector<4x256xf32>
    %cst_46 = arith.constant 0.000000e+00 : f32
    %112 = vector.shape_cast %18 : vector<1x256xi1> to vector<1x256xi1>
    %113 = vector.broadcast %112 : vector<1x256xi1> to vector<4x256xi1>
    %114 = vector.broadcast %cst_46 : f32 to vector<4x256xf32>
    %115 = arith.select %113, %109, %114 : vector<4x256xi1>, vector<4x256xf32>
    %116 = arith.addf %105, %115 : vector<4x256xf32>
    %cst_47 = arith.constant 0.000000e+00 : f32
    %117 = vector.shape_cast %20 : vector<1x256xi1> to vector<1x256xi1>
    %118 = vector.broadcast %117 : vector<1x256xi1> to vector<4x256xi1>
    %119 = vector.broadcast %cst_47 : f32 to vector<4x256xf32>
    %120 = arith.select %118, %111, %119 : vector<4x256xi1>, vector<4x256xf32>
    %121 = arith.addf %116, %120 : vector<4x256xf32>
    %c0_48 = arith.constant 0 : index
    %c0_49 = arith.constant 0 : index
    %122 = vector.load %arg7[%c0_48, %c0_49] : memref<4x1xf32, #tpu.memory_space<vmem>>, vector<4x1xf32>
    %123 = vector.broadcast %122 : vector<4x1xf32> to vector<4x256xf32>
    %124 = arith.addf %121, %123 : vector<4x256xf32>
    %cst_50 = arith.constant 2.000000e-01 : f32
    %125 = vector.broadcast %cst_50 : f32 to vector<4x256xf32>
    %126 = arith.mulf %125, %124 : vector<4x256xf32>
    %127 = arith.maximumf %124, %126 : vector<4x256xf32>
    %cst_51 = arith.constant 0.000000e+00 : f32
    %128 = vector.broadcast %cst_51 : f32 to vector<4x16xf32>
    %129 = vector.extract_strided_slice %127 {offsets = [0, 0], sizes = [4, 240], strides = [1, 1]} : vector<4x256xf32> to vector<4x240xf32>
    %130 = tpu.concatenate %128, %129 in 1 : vector<4x16xf32>, vector<4x240xf32> -> vector<4x256xf32>
    %c48 = arith.constant 48 : index
    %c0_52 = arith.constant 0 : index
    %131 = vector.load %arg13[%c48, %c0_52] : memref<72x256xf32, #tpu.memory_space<vmem>>, vector<4x256xf32>
    tpu.vector_store %arg13[%c48, %c0_52], %130 {strides = array<i32>} : memref<72x256xf32, #tpu.memory_space<vmem>>, vector<4x256xf32>,
    %c52 = arith.constant 52 : index
    %c0_53 = arith.constant 0 : index
    %132 = vector.load %arg13[%c52, %c0_53] : memref<72x256xf32, #tpu.memory_space<vmem>>, vector<4x256xf32>
    tpu.vector_store %arg13[%c52, %c0_53], %127 {strides = array<i32>} : memref<72x256xf32, #tpu.memory_space<vmem>>, vector<4x256xf32>,
    %133 = vector.extract_strided_slice %127 {offsets = [0, 16], sizes = [4, 240], strides = [1, 1]} : vector<4x256xf32> to vector<4x240xf32>
    %134 = tpu.concatenate %133, %128 in 1 : vector<4x240xf32>, vector<4x16xf32> -> vector<4x256xf32>
    %c56 = arith.constant 56 : index
    %c0_54 = arith.constant 0 : index
    %135 = vector.load %arg13[%c56, %c0_54] : memref<72x256xf32, #tpu.memory_space<vmem>>, vector<4x256xf32>
    tpu.vector_store %arg13[%c56, %c0_54], %134 {strides = array<i32>} : memref<72x256xf32, #tpu.memory_space<vmem>>, vector<4x256xf32>,
    %c0_55 = arith.constant 0 : index
    %c0_56 = arith.constant 0 : index
    %136 = vector.load %arg13[%c0_55, %c0_56] : memref<72x256xf32, #tpu.memory_space<vmem>>, vector<60x256xf32>
    %c0_57 = arith.constant 0 : index
    %c0_58 = arith.constant 0 : index
    %137 = vector.load %arg8[%c0_57, %c0_58] : memref<12x60xf32, #tpu.memory_space<vmem>>, vector<12x60xf32>
    %cst_59 = arith.constant dense<0.000000e+00> : vector<12x256xf32>
    %138 = tpu.matmul %137, %136, %cst_59 {dimension_numbers = #tpu.dot_dimension_numbers<[1], [0], [0], [1], [0, 0, 1, 1], [], []>} : vector<12x60xf32>, vector<60x256xf32>, vector<12x256xf32> -> vector<12x256xf32>
    %139 = vector.extract_strided_slice %138 {offsets = [0, 0], sizes = [4, 256], strides = [1, 1]} : vector<12x256xf32> to vector<4x256xf32>
    %140 = vector.extract_strided_slice %138 {offsets = [4, 0], sizes = [4, 256], strides = [1, 1]} : vector<12x256xf32> to vector<4x256xf32>
    %141 = vector.extract_strided_slice %138 {offsets = [8, 0], sizes = [4, 256], strides = [1, 1]} : vector<12x256xf32> to vector<4x256xf32>
    %cst_60 = arith.constant 0.000000e+00 : f32
    %142 = vector.broadcast %cst_60 : f32 to vector<4x1xf32>
    %143 = vector.extract_strided_slice %139 {offsets = [0, 0], sizes = [4, 255], strides = [1, 1]} : vector<4x256xf32> to vector<4x255xf32>
    %144 = tpu.concatenate %142, %143 in 1 : vector<4x1xf32>, vector<4x255xf32> -> vector<4x256xf32>
    %145 = vector.extract_strided_slice %141 {offsets = [0, 1], sizes = [4, 255], strides = [1, 1]} : vector<4x256xf32> to vector<4x255xf32>
    %146 = tpu.concatenate %145, %142 in 1 : vector<4x255xf32>, vector<4x1xf32> -> vector<4x256xf32>
    %cst_61 = arith.constant 0.000000e+00 : f32
    %147 = vector.shape_cast %18 : vector<1x256xi1> to vector<1x256xi1>
    %148 = vector.broadcast %147 : vector<1x256xi1> to vector<4x256xi1>
    %149 = vector.broadcast %cst_61 : f32 to vector<4x256xf32>
    %150 = arith.select %148, %144, %149 : vector<4x256xi1>, vector<4x256xf32>
    %151 = arith.addf %140, %150 : vector<4x256xf32>
    %cst_62 = arith.constant 0.000000e+00 : f32
    %152 = vector.shape_cast %20 : vector<1x256xi1> to vector<1x256xi1>
    %153 = vector.broadcast %152 : vector<1x256xi1> to vector<4x256xi1>
    %154 = vector.broadcast %cst_62 : f32 to vector<4x256xf32>
    %155 = arith.select %153, %146, %154 : vector<4x256xi1>, vector<4x256xf32>
    %156 = arith.addf %151, %155 : vector<4x256xf32>
    %c0_63 = arith.constant 0 : index
    %c0_64 = arith.constant 0 : index
    %157 = vector.load %arg9[%c0_63, %c0_64] : memref<4x1xf32, #tpu.memory_space<vmem>>, vector<4x1xf32>
    %158 = vector.broadcast %157 : vector<4x1xf32> to vector<4x256xf32>
    %159 = arith.addf %156, %158 : vector<4x256xf32>
    %cst_65 = arith.constant 2.000000e-01 : f32
    %160 = vector.broadcast %cst_65 : f32 to vector<4x256xf32>
    %161 = arith.mulf %160, %159 : vector<4x256xf32>
    %162 = arith.maximumf %159, %161 : vector<4x256xf32>
    %cst_66 = arith.constant 0.000000e+00 : f32
    %163 = vector.broadcast %cst_66 : f32 to vector<4x16xf32>
    %164 = vector.extract_strided_slice %162 {offsets = [0, 0], sizes = [4, 240], strides = [1, 1]} : vector<4x256xf32> to vector<4x240xf32>
    %165 = tpu.concatenate %163, %164 in 1 : vector<4x16xf32>, vector<4x240xf32> -> vector<4x256xf32>
    %c60 = arith.constant 60 : index
    %c0_67 = arith.constant 0 : index
    %166 = vector.load %arg13[%c60, %c0_67] : memref<72x256xf32, #tpu.memory_space<vmem>>, vector<4x256xf32>
    tpu.vector_store %arg13[%c60, %c0_67], %165 {strides = array<i32>} : memref<72x256xf32, #tpu.memory_space<vmem>>, vector<4x256xf32>,
    %c64 = arith.constant 64 : index
    %c0_68 = arith.constant 0 : index
    %167 = vector.load %arg13[%c64, %c0_68] : memref<72x256xf32, #tpu.memory_space<vmem>>, vector<4x256xf32>
    tpu.vector_store %arg13[%c64, %c0_68], %162 {strides = array<i32>} : memref<72x256xf32, #tpu.memory_space<vmem>>, vector<4x256xf32>,
    %168 = vector.extract_strided_slice %162 {offsets = [0, 16], sizes = [4, 240], strides = [1, 1]} : vector<4x256xf32> to vector<4x240xf32>
    %169 = tpu.concatenate %168, %163 in 1 : vector<4x240xf32>, vector<4x16xf32> -> vector<4x256xf32>
    %c68 = arith.constant 68 : index
    %c0_69 = arith.constant 0 : index
    %170 = vector.load %arg13[%c68, %c0_69] : memref<72x256xf32, #tpu.memory_space<vmem>>, vector<4x256xf32>
    tpu.vector_store %arg13[%c68, %c0_69], %169 {strides = array<i32>} : memref<72x256xf32, #tpu.memory_space<vmem>>, vector<4x256xf32>,
    %c0_70 = arith.constant 0 : index
    %c0_71 = arith.constant 0 : index
    %171 = vector.load %arg13[%c0_70, %c0_71] : memref<72x256xf32, #tpu.memory_space<vmem>>, vector<72x256xf32>
    %c0_72 = arith.constant 0 : index
    %c0_73 = arith.constant 0 : index
    %172 = vector.load %arg10[%c0_72, %c0_73] : memref<24x72xf32, #tpu.memory_space<vmem>>, vector<24x72xf32>
    %cst_74 = arith.constant dense<0.000000e+00> : vector<24x256xf32>
    %173 = tpu.matmul %172, %171, %cst_74 {dimension_numbers = #tpu.dot_dimension_numbers<[1], [0], [0], [1], [0, 0, 1, 1], [], []>} : vector<24x72xf32>, vector<72x256xf32>, vector<24x256xf32> -> vector<24x256xf32>
    %174 = vector.extract_strided_slice %173 {offsets = [0, 0], sizes = [8, 256], strides = [1, 1]} : vector<24x256xf32> to vector<8x256xf32>
    %175 = vector.extract_strided_slice %173 {offsets = [8, 0], sizes = [8, 256], strides = [1, 1]} : vector<24x256xf32> to vector<8x256xf32>
    %176 = vector.extract_strided_slice %173 {offsets = [16, 0], sizes = [8, 256], strides = [1, 1]} : vector<24x256xf32> to vector<8x256xf32>
    %cst_75 = arith.constant 0.000000e+00 : f32
    %177 = vector.broadcast %cst_75 : f32 to vector<8x1xf32>
    %178 = vector.extract_strided_slice %174 {offsets = [0, 0], sizes = [8, 255], strides = [1, 1]} : vector<8x256xf32> to vector<8x255xf32>
    %179 = tpu.concatenate %177, %178 in 1 : vector<8x1xf32>, vector<8x255xf32> -> vector<8x256xf32>
    %180 = vector.extract_strided_slice %176 {offsets = [0, 1], sizes = [8, 255], strides = [1, 1]} : vector<8x256xf32> to vector<8x255xf32>
    %181 = tpu.concatenate %180, %177 in 1 : vector<8x255xf32>, vector<8x1xf32> -> vector<8x256xf32>
    %cst_76 = arith.constant 0.000000e+00 : f32
    %182 = vector.shape_cast %18 : vector<1x256xi1> to vector<1x256xi1>
    %183 = vector.broadcast %182 : vector<1x256xi1> to vector<8x256xi1>
    %184 = vector.broadcast %cst_76 : f32 to vector<8x256xf32>
    %185 = arith.select %183, %179, %184 : vector<8x256xi1>, vector<8x256xf32>
    %186 = arith.addf %175, %185 : vector<8x256xf32>
    %cst_77 = arith.constant 0.000000e+00 : f32
    %187 = vector.shape_cast %20 : vector<1x256xi1> to vector<1x256xi1>
    %188 = vector.broadcast %187 : vector<1x256xi1> to vector<8x256xi1>
    %189 = vector.broadcast %cst_77 : f32 to vector<8x256xf32>
    %190 = arith.select %188, %181, %189 : vector<8x256xi1>, vector<8x256xf32>
    %191 = arith.addf %186, %190 : vector<8x256xf32>
    %c0_78 = arith.constant 0 : index
    %c0_79 = arith.constant 0 : index
    %192 = vector.load %arg11[%c0_78, %c0_79] : memref<8x1xf32, #tpu.memory_space<vmem>>, vector<8x1xf32>
    %193 = vector.broadcast %192 : vector<8x1xf32> to vector<8x256xf32>
    %194 = arith.addf %191, %193 : vector<8x256xf32>
    %cst_80 = arith.constant 2.000000e-01 : f32
    %195 = vector.broadcast %cst_80 : f32 to vector<8x256xf32>
    %196 = arith.mulf %194, %195 : vector<8x256xf32>
    %197 = arith.addf %196, %22 : vector<8x256xf32>
    %c0_81 = arith.constant 0 : index
    %c0_82 = arith.constant 0 : index
    %c0_83 = arith.constant 0 : index
    %198 = vector.load %arg12[%c0_81, %c0_82, %c0_83] : memref<1x8x256xf32, #tpu.memory_space<vmem>>, vector<1x8x256xf32>
    %199 = vector.shape_cast %198 : vector<1x8x256xf32> to vector<8x256xf32>
    %200 = vector.shape_cast %197 : vector<8x256xf32> to vector<1x8x256xf32>
    tpu.vector_store %arg12[%c0_81, %c0_82, %c0_83], %200 {strides = array<i32>} : memref<1x8x256xf32, #tpu.memory_space<vmem>>, vector<1x8x256xf32>,
    return
  }
  func.func @transform_0(%arg0: i32) -> (i32, i32, i32) {
    %c0_i32 = arith.constant 0 : i32
    %c0_i32_0 = arith.constant 0 : i32
    %c0_i32_1 = arith.constant 0 : i32
    return %arg0, %c0_i32, %c0_i32_0 : i32, i32, i32
  }
  func.func @transform_1(%arg0: i32) -> (i32, i32) {
    %c0_i32 = arith.constant 0 : i32
    %c0_i32_0 = arith.constant 0 : i32
    %c0_i32_1 = arith.constant 0 : i32
    return %c0_i32, %c0_i32_0 : i32, i32
  }
  func.func @transform_2(%arg0: i32) -> (i32, i32) {
    %c0_i32 = arith.constant 0 : i32
    %c0_i32_0 = arith.constant 0 : i32
    %c0_i32_1 = arith.constant 0 : i32
    return %c0_i32, %c0_i32_0 : i32, i32
  }
  func.func @transform_3(%arg0: i32) -> (i32, i32) {
    %c0_i32 = arith.constant 0 : i32
    %c0_i32_0 = arith.constant 0 : i32
    %c0_i32_1 = arith.constant 0 : i32
    return %c0_i32, %c0_i32_0 : i32, i32
  }
  func.func @transform_4(%arg0: i32) -> (i32, i32) {
    %c0_i32 = arith.constant 0 : i32
    %c0_i32_0 = arith.constant 0 : i32
    %c0_i32_1 = arith.constant 0 : i32
    return %c0_i32, %c0_i32_0 : i32, i32
  }
  func.func @transform_5(%arg0: i32) -> (i32, i32) {
    %c0_i32 = arith.constant 0 : i32
    %c0_i32_0 = arith.constant 0 : i32
    %c0_i32_1 = arith.constant 0 : i32
    return %c0_i32, %c0_i32_0 : i32, i32
  }
  func.func @transform_6(%arg0: i32) -> (i32, i32) {
    %c0_i32 = arith.constant 0 : i32
    %c0_i32_0 = arith.constant 0 : i32
    %c0_i32_1 = arith.constant 0 : i32
    return %c0_i32, %c0_i32_0 : i32, i32
  }
  func.func @transform_7(%arg0: i32) -> (i32, i32) {
    %c0_i32 = arith.constant 0 : i32
    %c0_i32_0 = arith.constant 0 : i32
    %c0_i32_1 = arith.constant 0 : i32
    return %c0_i32, %c0_i32_0 : i32, i32
  }
  func.func @transform_8(%arg0: i32) -> (i32, i32) {
    %c0_i32 = arith.constant 0 : i32
    %c0_i32_0 = arith.constant 0 : i32
    %c0_i32_1 = arith.constant 0 : i32
    return %c0_i32, %c0_i32_0 : i32, i32
  }
  func.func @transform_9(%arg0: i32) -> (i32, i32) {
    %c0_i32 = arith.constant 0 : i32
    %c0_i32_0 = arith.constant 0 : i32
    %c0_i32_1 = arith.constant 0 : i32
    return %c0_i32, %c0_i32_0 : i32, i32
  }
  func.func @transform_10(%arg0: i32) -> (i32, i32) {
    %c0_i32 = arith.constant 0 : i32
    %c0_i32_0 = arith.constant 0 : i32
    %c0_i32_1 = arith.constant 0 : i32
    return %c0_i32, %c0_i32_0 : i32, i32
  }
  func.func @transform_11(%arg0: i32) -> (i32, i32, i32) {
    %c0_i32 = arith.constant 0 : i32
    %c0_i32_0 = arith.constant 0 : i32
    %c0_i32_1 = arith.constant 0 : i32
    return %arg0, %c0_i32, %c0_i32_0 : i32, i32, i32
  }
}

</mosaic_0001>

<bundles_post_ra>
// kernel: residual_dense_block.1
= control target key start
LH: loop header
LB: loop body
LE: loop exit
PB: predicated region body
PF: predicated region fallthrough
CT: control target
= control target key end

     0   :  { %s1537_s17 = smov 0   ;;  %s1868_s0 = inlined_call_operand.vmem [shape: f32[2,8,256], index: 0, kind: input, shape index: {}]   ;;  %s1869_s1 = inlined_call_operand.vmem [shape: f32[12,24], index: 1, kind: input, shape index: {}]   ;;  %s1870_s2 = inlined_call_operand.vmem [shape: f32[4,1], index: 2, kind: input, shape index: {}]   ;;  %s1871_s3 = inlined_call_operand.vmem [shape: f32[12,36], index: 3, kind: input, shape index: {}]   ;;  %s1872_s4 = inlined_call_operand.vmem [shape: f32[4,1], index: 4, kind: input, shape index: {}]   ;;  %s1873_s5 = inlined_call_operand.vmem [shape: f32[12,48], index: 5, kind: input, shape index: {}]   ;;  %s1874_s6 = inlined_call_operand.vmem [shape: f32[4,1], index: 6, kind: input, shape index: {}]   ;;  %s1875_s7 = inlined_call_operand.vmem [shape: f32[12,60], index: 7, kind: input, shape index: {}]   ;;  %s1876_s8 = inlined_call_operand.vmem [shape: f32[4,1], index: 8, kind: input, shape index: {}]   ;;  %s1877_s9 = inlined_call_operand.vmem [shape: f32[24,72], index: 9, kind: input, shape index: {}]   ;;  %s1878_s10 = inlined_call_operand.vmem [shape: f32[8,1], index: 10, kind: input, shape index: {}]   ;;  %s1879_s11 = inlined_call_operand.vmem [shape: f32[2,8,256], index: 11, kind: output, shape index: {}]  }
   0x1 LB: > { %s1404_s18 = sadd.s32 4294967295, %s1469_s17   ;;  %p1408_p0 = scmp.ge.s32.totalorder %s1469_s17, 1  ;;  %s1469_s17 = sphi %s1537_s17, %s21_s17  }
   0x2   : > { %p337_p1 = scmp.lt.s32.totalorder %s1469_s17, 3 }
   0x4   : > { %p338_p2 = pnand %p1408_p0, %p337_p1 }
   0x5   : > { %p377_p3 = scmp.lt.s32.totalorder (!%p338_p2), %s1404_s18, 1  ;;  %s1472_s23 = smov (!%p338_p2), 112  }
   0x6   : > { %341 = sbr.rel (%p338_p2) target bundleno = 2345 (0x929), region = 64  ;;  %s1473_s24 = smov (!%p338_p2), 16  }
   0x7   : > { %s1475_s29 = smov (!%p338_p2), 1   ;;  %s1476_s13 = smov (!%p338_p2), 127  }
   0xb   : > { %s1891_s18 = smov (!%p377_p3, %s1404_s18), 1  ;;  %v1471_v0 = vmov 0.0   ;;  %vm439_vm0 = vcmask 916480   ;;  %vm426_vm1 = vcmask 130048   ;;  %v452_v9 = vld [vmem:[%s1869_s1] sm:$0xff]  ;;  %vm454_vm2 = vcmask 195584  }
   0xc   : > { %525 = vmatprep.mubr.f32.mxu1 %v1471_v0  ;;  %904 = vmatprep.mubr.f32.mxu0 %v1471_v0  ;;  %s1430_s19 = sshll.u32 %s1891_s18, 4  ;;  %vm1589_vm3 = vmneg %vm426_vm1  ;;  %v453_v11 = vld [vmem:[%s1869_s1 + $0x8] sm:$0xf]  ;;  %v1474_v12 = vmov 0   ;;  %v588_v15 = vld [vmem:[%s1870_s2] sm:$0xf]  ;;  %v387_v18 = vlaneseq }
   0xd   : > { %s381_s22 = scalar_lea.vmem %s1868_s0, %s1430_s19  ;;  %1446 = vset.pattern.permute.xlu0 %v1474_v12  ;;  %1447 = vset.pattern.permute.xlu1 %v1474_v12  ;;  %vm544_vm4 = vcmask 7168   ;;  %vm555_vm7 = vcmask 1039360   ;;  %v774_v57 = vld [vmem:[%s1872_s4] sm:$0xf]  ;;  %vm650_vm10 = vcmask 1043456   ;;  %vm643_vm11 = vcmask 293888   ;;  %s386_s14 = scalar_lea.vmem %s1879_s11, %s1430_s19 }
   0xe   : > { %v1555_v1 = vld [vmem:[%s381_s22 + $0x8] sm:$0xff]  ;;  %v1557_v2 = vld [vmem:[%s381_s22] sm:$0xff]  ;;  %v388_v19 = vand.u32 127, %v387_v18  ;;  %vm833_vm12 = vcmask 392192   ;;  %vm1018_vm13 = vcmask 490496   ;;  %vm1214_vm14 = vcmask 588800  }
   0xf   : > { %437 = vrot.lane.b32.xlu0 %v1555_v1, %s1472_s23  ;;  %422 = vrot.lane.b32.xlu1 %v1557_v2, %s1473_s24 }
  0x10   : > { %v389_v20 = vadd.s32 128, %v388_v19  ;;  %v394_v22 = vand.u32 15, %v388_v19 }
  0x12   : > { %v401_v21 = vand.u32 15, %v389_v20  ;;  %vm1612_vm6 = vcmp.ge.s32.totalorder %v394_v22, 1  ;;  %vm1629_vm9 = vcmp.le.s32.totalorder %v394_v22, 14 }
  0x13   : > { %424 = vrot.lane.b32.xlu1 %v1555_v1, %s1473_s24  ;;  %435 = vrot.lane.b32.xlu0 %v1557_v2, %s1472_s23 }
  0x14   : > { %vm1608_vm5 = vcmp.ge.s32.totalorder %v401_v21, 1  ;;  %vm1620_vm8 = vcmp.le.s32.totalorder %v401_v21, 14 }
  0x81   : > { %v1567_v3 = vpop.permute.xlu0 %437  ;;  %v1569_v4 = vpop.permute.xlu1 %422 }
  0x82   : > { %1448 = vmatprep.subr.msk.mxu1 %vm439_vm0, %v1567_v3 }
  0x85   : > { %v425_v5 = vpop.permute.xlu1 %424  ;;  %v436_v6 = vpop.permute.xlu0 %435 }
  0x86   : > { %v1575_v7 = vsel %vm426_vm1, %v1569_v4, %v425_v5  ;;  %v1579_v8 = vsel %vm439_vm0, %v436_v6, %v1567_v3 }
  0x87   : > { %488 = vmatpush1.msra.mxu1 %v1579_v8 }
  0x88   : > { %489 = vmatprep.subr.mxu1 %v1555_v1 }
  0x89   : > { %490 = vmatpush1.msra.mxu1 %v1557_v2 }
  0x8a   : > { %491 = vmatprep.subr.mxu1 %v1575_v7 }
  0x8b   : > { %1450 = vmatpush1.msk.msra.mxu1 %vm1589_vm3, %v1569_v4 }
  0x8c   : > { %1413 = vmatmul.mubr.msk.f32.vlgmr.msra.gmra.mxu1 %vm454_vm2, %v452_v9 }
  0x8d   : > { %531 = vmatprep.mubr.f32.mxu1 %v1471_v0 }
  0x90   : > { %1414 = vmatmul.mubr.msk.f32.gmra.mxu1 %vm454_vm2, %v453_v11 }
  0x91   : > { %721 = vmatprep.mubr.f32.mxu1 %v1471_v0 }
 0x14c   : > { %v527_v13 = vpop.f32.mrf.mxu1 }
 0x14d   : > { %540 = vrot.lane.b32.xlu0 %v527_v13, %s1475_s29 }
 0x14e   : > { %v529_v14 = vpop.f32.mrf.mxu1 }
 0x14f   : > { %542 = vrot.lane.b32.xlu1 %v529_v14, %s1475_s29 }
 0x150   : > { %v533_v16 = vpop.f32.mrf.mxu1 }
 0x151   : > { %591 = vperm.xlu0 %1446, %v588_v15  }
 0x152   : > { %v535_v17 = vpop.f32.mrf.mxu1 }
 0x153   : > { %553 = vrot.lane.b32.xlu1 %v535_v17, %s1476_s13  ;;  %v642_v17 = vld [vmem:[%s1871_s3 + $0x8] sm:$0xf] }
 0x157   : > { %551 = vrot.lane.b32.xlu1 %v533_v16, %s1476_s13  ;;  %v641_v16 = vld [vmem:[%s1871_s3] sm:$0xff] }
 0x1bf   : > { %v541_v23 = vpop.permute.xlu0 %540 }
 0x1c0   : > { %v548_v27 = vsel %vm544_vm4, 0.0, %v541_v23 }
 0x1c1   : > { %v543_v25 = vpop.permute.xlu1 %542  ;;  %v564_v31 = vsel %vm1612_vm6, %v548_v27, 0.0 }
 0x1c2   : > { %v545_v28 = vsel %vm544_vm4, %v541_v23, %v543_v25  ;;  %v568_v36 = vrot.slane %v564_v31, 4 }
 0x1c3   : > { %v565_v29 = vsel %vm1608_vm5, %v545_v28, 0.0 }
 0x1c4   : > { %v569_v34 = vrot.slane %v565_v29, 4  ;;  %v572_v43 = vadd.f32 %v568_v36, %v527_v13 }
 0x1c5   : > { %v554_v32 = vpop.permute.xlu1 %553 }
 0x1c6   : > { %v559_v33 = vsel %vm555_vm7, %v554_v32, 0.0  ;;  %v573_v41 = vadd.f32 %v569_v34, %v529_v14 }
 0x1c7   : > { %v579_v35 = vsel %vm1620_vm8, %v559_v33, 0.0 }
 0x1c8   : > { %v583_v38 = vrot.slane %v579_v35, 4 }
 0x1c9   : > { %v552_v39 = vpop.permute.xlu1 %551 }
 0x1ca   : > { %v556_v40 = vsel %vm555_vm7, %v552_v39, %v554_v32  ;;  %v587_v46 = vadd.f32 %v583_v38, %v573_v41 }
 0x1cb   : > { %v578_v42 = vsel %vm1629_vm9, %v556_v40, 0.0 }
 0x1cc   : > { %v582_v44 = vrot.slane %v578_v42, 4  ;;  %v592_v45 = vpop.permute.xlu0 %591 }
 0x1cd   : > { %v593_v47 = vrot.slane %v592_v45, 4 }
 0x1ce   : > { %v586_v48 = vadd.f32 %v582_v44, %v572_v43 }
 0x1cf   : > { %v596_v49 = vadd.f32 %v593_v47, %v587_v46 }
 0x1d0   : > { %v595_v50 = vadd.f32 %v593_v47, %v586_v48 }
 0x1d1   : > { %v598_v51 = vmul.f32 0.2, %v596_v49 }
 0x1d2   : > { %v597_v52 = vmul.f32 0.2, %v595_v50 }
 0x1d3   : > { %v600_v53 = vmax.f32 %v596_v49, %v598_v51 }
 0x1d4   : > { %v599_v54 = vmax.f32 %v595_v50, %v597_v52 }
 0x1d5   : > { %619 = vrot.lane.b32.xlu0 %v600_v53, %s1472_s23  ;;  %616 = vst [vmem:[#allocation2 + $0x80] sm:$0xf0] %v600_v53  ;;  %v604_v56 = vrot.slane %v600_v53, 4 }
 0x1d6   : > { %617 = vrot.lane.b32.xlu1 %v599_v54, %s1472_s23  ;;  %615 = vst [vmem:[#allocation2 + $0x70] sm:$0xf0] %v599_v54  ;;  %v603_v55 = vrot.slane %v599_v54, 4 }
 0x1d9   : > { %605 = vrot.lane.b32.xlu0 %v603_v55, %s1473_s24 }
 0x1da   : > { %607 = vrot.lane.b32.xlu1 %v604_v56, %s1473_s24  ;;  %v957_v56 = vld [vmem:[%s1874_s6] sm:$0xf] }
 0x1dd   : > { %777 = vperm.xlu0 %1446, %v774_v57  }
 0x247   : > { %v620_v58 = vpop.permute.xlu0 %619 }
 0x248   : > { %v623_v59 = vsel %vm439_vm0, %v620_v58, 0.0  ;;  %v618_v60 = vpop.permute.xlu1 %617 }
 0x249   : > { %v626_v61 = vrot.slane %v623_v59, 4  ;;  %v621_v62 = vsel %vm439_vm0, %v618_v60, %v620_v58 }
 0x24a   : > { %v625_v63 = vrot.slane %v621_v62, 4 }
 0x24b   : > { %630 = vst [vmem:[#allocation2 + $0x40] sm:$0xf] %v626_v61  ;;  %v606_v5 = vpop.permute.xlu0 %605 }
 0x24c   : > { %629 = vst [vmem:[#allocation2 + $0x88] sm:$0xf] %v625_v63  ;;  %v612_v6 = vsel %vm426_vm1, 0.0, %v606_v5  ;;  %v608_v9 = vpop.permute.xlu1 %607 }
 0x24d   : > { %613 = vst [vmem:[#allocation2 + $0x70] sm:$0xf] %v612_v6  ;;  %v609_v11 = vsel %vm426_vm1, %v606_v5, %v608_v9 }
 0x24e   : > { %614 = vst [vmem:[#allocation2 + $0x80] sm:$0xf] %v609_v11 }
 0x252   : > { %v640_v12 = vld [vmem:[#allocation2 + $0x40] sm:$0xf] }
 0x253   : > { %1415 = vmatprep.subr.msk.mxu1 %vm650_vm10, %v640_v12  ;;  %v639_v13 = vld [vmem:[#allocation2 + $0x88] sm:$0xf] }
 0x254   : > { %1416 = vmatpush1.msk.msra.mxu1 %vm650_vm10, %v639_v13  ;;  %v1652_v15 = vld [vmem:[#allocation2 + $0x70] sm:$0xff] }
 0x255   : > { %v1649_v14 = vld [vmem:[#allocation2 + $0x80] sm:$0xff] }
 0x256   : > { %681 = vmatprep.subr.mxu1 %v1649_v14 }
 0x257   : > { %682 = vmatpush1.msra.mxu1 %v1652_v15 }
 0x258   : > { %1451 = vmatprep.subr.msk.mxu1 %vm439_vm0, %v1567_v3  ;;  %v778_v22 = vpop.permute.xlu0 %777 }
 0x259   : > { %684 = vmatpush1.msra.mxu1 %v1579_v8  ;;  %v779_v45 = vrot.slane %v778_v22, 4 }
 0x25a   : > { %685 = vmatprep.subr.mxu1 %v1555_v1 }
 0x25b   : > { %686 = vmatpush1.msra.mxu1 %v1557_v2 }
 0x25c   : > { %687 = vmatprep.subr.mxu1 %v1575_v7 }
 0x25d   : > { %1453 = vmatpush1.msk.msra.mxu1 %vm1589_vm3, %v1569_v4 }
 0x25e   : > { %1417 = vmatmul.mubr.msk.f32.vlgmr.msra.gmra.mxu1 %vm643_vm11, %v641_v16 }
 0x25f   : > { %727 = vmatprep.mubr.f32.mxu1 %v1471_v0 }
 0x262   : > { %1418 = vmatmul.mubr.msk.f32.gmra.mxu1 %vm643_vm11, %v642_v17  ;;  %v831_v17 = vld [vmem:[%s1873_s5] sm:$0xff] }
 0x263   : > { %1095 = vmatprep.mubr.f32.mxu1 %v1471_v0 }
 0x31e   : > { %v723_v18 = vpop.f32.mrf.mxu1 }
 0x31f   : > { %736 = vrot.lane.b32.xlu0 %v723_v18, %s1475_s29 }
 0x320   : > { %v725_v19 = vpop.f32.mrf.mxu1 }
 0x321   : > { %738 = vrot.lane.b32.xlu1 %v725_v19, %s1475_s29 }
 0x322   : > { %v729_v20 = vpop.f32.mrf.mxu1 }
 0x324   : > { %v731_v21 = vpop.f32.mrf.mxu1 }
 0x325   : > { %746 = vrot.lane.b32.xlu1 %v729_v20, %s1476_s13  ;;  %748 = vrot.lane.b32.xlu0 %v731_v21, %s1476_s13 }
 0x391   : > { %v737_v23 = vpop.permute.xlu0 %736 }
 0x392   : > { %v743_v25 = vsel %vm544_vm4, 0.0, %v737_v23 }
 0x393   : > { %v754_v27 = vsel %vm1612_vm6, %v743_v25, 0.0  ;;  %v739_v28 = vpop.permute.xlu1 %738 }
 0x394   : > { %v740_v29 = vsel %vm544_vm4, %v737_v23, %v739_v28  ;;  %v758_v32 = vrot.slane %v754_v27, 4 }
 0x395   : > { %v755_v31 = vsel %vm1608_vm5, %v740_v29, 0.0 }
 0x396   : > { %v759_v33 = vrot.slane %v755_v31, 4  ;;  %v762_v41 = vadd.f32 %v758_v32, %v723_v18  ;;  %v832_v18 = vld [vmem:[%s1873_s5 + $0x8] sm:$0xf] }
 0x397   : > { %v747_v34 = vpop.permute.xlu1 %746  ;;  %v749_v35 = vpop.permute.xlu0 %748 }
 0x398   : > { %v750_v36 = vsel %vm555_vm7, %v747_v34, %v749_v35  ;;  %v753_v38 = vsel %vm555_vm7, %v749_v35, 0.0  ;;  %v763_v42 = vadd.f32 %v759_v33, %v725_v19 }
 0x399   : > { %v764_v39 = vsel %vm1629_vm9, %v750_v36, 0.0  ;;  %v765_v40 = vsel %vm1620_vm8, %v753_v38, 0.0 }
 0x39a   : > { %v768_v43 = vrot.slane %v764_v39, 4  ;;  %v769_v44 = vrot.slane %v765_v40, 4 }
 0x39c   : > { %v772_v46 = vadd.f32 %v768_v43, %v762_v41  ;;  %v773_v47 = vadd.f32 %v769_v44, %v763_v42 }
 0x39e   : > { %v781_v48 = vadd.f32 %v779_v45, %v772_v46  ;;  %v782_v49 = vadd.f32 %v779_v45, %v773_v47 }
 0x3a0   : > { %v784_v50 = vmul.f32 0.2, %v782_v49  ;;  %v783_v51 = vmul.f32 0.2, %v781_v48 }
 0x3a2   : > { %v786_v52 = vmax.f32 %v782_v49, %v784_v50  ;;  %v785_v53 = vmax.f32 %v781_v48, %v783_v51 }
 0x3a4   : > { %v790_v54 = vrot.slane %v786_v52, 4  ;;  %v789_v55 = vrot.slane %v785_v53, 4 }
 0x3a6   : > { %793 = vrot.lane.b32.xlu0 %v790_v54, %s1473_s24  ;;  %808 = vst [vmem:[#allocation2 + $0x28] sm:$0xf] %v790_v54  ;;  %791 = vrot.lane.b32.xlu1 %v789_v55, %s1473_s24  ;;  %807 = vst [vmem:[#allocation2 + $0x50] sm:$0xf] %v789_v55 }
 0x3aa   : > { %809 = vrot.lane.b32.xlu0 %v785_v53, %s1472_s23  ;;  %811 = vrot.lane.b32.xlu1 %v786_v52, %s1472_s23 }
 0x3ae   : > { %960 = vperm.xlu1 %1447, %v957_v56  }
 0x418   : > { %v794_v57 = vpop.permute.xlu0 %793  ;;  %v792_v58 = vpop.permute.xlu1 %791 }
 0x419   : > { %v795_v59 = vsel %vm426_vm1, %v792_v58, %v794_v57  ;;  %v797_v60 = vsel %vm426_vm1, 0.0, %v792_v58  ;;  %v1148_v57 = vld [vmem:[%s1876_s8] sm:$0xf] }
 0x41a   : > { %v799_v61 = vrot.slane %v797_v60, 4  ;;  %v800_v62 = vrot.slane %v795_v59, 4 }
 0x41c   : > { %803 = vst [vmem:[#allocation2 + $0x88] sm:$0xf0] %v799_v61  ;;  %804 = vst [vmem:[#allocation2 + $0x40] sm:$0xf0] %v800_v62  ;;  %v810_v63 = vpop.permute.xlu0 %809  ;;  %v812_v5 = vpop.permute.xlu1 %811 }
 0x41d   : > { %v813_v6 = vsel %vm439_vm0, %v810_v63, %v812_v5  ;;  %v816_v9 = vsel %vm439_vm0, %v812_v5, 0.0 }
 0x41e   : > { %817 = vst [vmem:[#allocation2 + $0x50] sm:$0xf0] %v813_v6  ;;  %818 = vst [vmem:[#allocation2 + $0x28] sm:$0xf0] %v816_v9 }
 0x423   : > { %v1705_v13 = vld [vmem:[#allocation2 + $0x40] sm:$0xff]  ;;  %v1708_v16 = vld [vmem:[#allocation2 + $0x88] sm:$0xff] }
 0x425   : > { %v1699_v11 = vld [vmem:[#allocation2 + $0x28] sm:$0xff]  ;;  %v1701_v12 = vld [vmem:[#allocation2 + $0x50] sm:$0xff] }
 0x426   : > { %860 = vmatprep.subr.mxu0 %v1699_v11 }
 0x427   : > { %861 = vmatpush1.msra.mxu0 %v1701_v12 }
 0x428   : > { %862 = vmatprep.subr.mxu0 %v1705_v13 }
 0x429   : > { %863 = vmatpush1.msra.mxu0 %v1708_v16  ;;  %v961_v23 = vpop.permute.xlu1 %960 }
 0x42a   : > { %864 = vmatprep.subr.mxu0 %v1649_v14  ;;  %v962_v46 = vrot.slane %v961_v23, 4  ;;  %v1017_v23 = vld [vmem:[%s1875_s7 + $0x8] sm:$0xf] }
 0x42b   : > { %865 = vmatpush1.msra.mxu0 %v1652_v15 }
 0x42c   : > { %1454 = vmatprep.subr.msk.mxu0 %vm439_vm0, %v1567_v3 }
 0x42d   : > { %867 = vmatpush1.msra.mxu0 %v1579_v8 }
 0x42e   : > { %868 = vmatprep.subr.mxu0 %v1555_v1 }
 0x42f   : > { %869 = vmatpush1.msra.mxu0 %v1557_v2 }
 0x430   : > { %870 = vmatprep.subr.mxu0 %v1575_v7 }
 0x431   : > { %1456 = vmatpush1.msk.msra.mxu0 %vm1589_vm3, %v1569_v4 }
 0x432   : > { %1419 = vmatmul.mubr.msk.f32.vlgmr.msra.gmra.mxu0 %vm833_vm12, %v831_v17 }
 0x433   : > { %910 = vmatprep.mubr.f32.mxu0 %v1471_v0 }
 0x436   : > { %1420 = vmatmul.mubr.msk.f32.gmra.mxu0 %vm833_vm12, %v832_v18 }
 0x437   : > { %1288 = vmatprep.mubr.f32.mxu0 %v1471_v0 }
 0x4f2   : > { %v906_v19 = vpop.f32.mrf.mxu0 }
 0x4f3   : > { %919 = vrot.lane.b32.xlu1 %v906_v19, %s1475_s29 }
 0x4f4   : > { %v908_v20 = vpop.f32.mrf.mxu0 }
 0x4f5   : > { %921 = vrot.lane.b32.xlu0 %v908_v20, %s1475_s29 }
 0x4f6   : > { %v912_v21 = vpop.f32.mrf.mxu0 }
 0x4f7   : > { %929 = vrot.lane.b32.xlu1 %v912_v21, %s1476_s13 }
 0x4f8   : > { %v914_v22 = vpop.f32.mrf.mxu0 }
 0x4f9   : > { %931 = vrot.lane.b32.xlu0 %v914_v22, %s1476_s13  ;;  %v1016_v22 = vld [vmem:[%s1875_s7] sm:$0xff] }
 0x565   : > { %v920_v25 = vpop.permute.xlu1 %919 }
 0x566   : > { %v926_v27 = vsel %vm544_vm4, 0.0, %v920_v25 }
 0x567   : > { %v937_v28 = vsel %vm1612_vm6, %v926_v27, 0.0  ;;  %v922_v29 = vpop.permute.xlu0 %921 }
 0x568   : > { %v923_v31 = vsel %vm544_vm4, %v920_v25, %v922_v29  ;;  %v941_v33 = vrot.slane %v937_v28, 4 }
 0x569   : > { %v938_v32 = vsel %vm1608_vm5, %v923_v31, 0.0  ;;  %v930_v35 = vpop.permute.xlu1 %929 }
 0x56a   : > { %v942_v34 = vrot.slane %v938_v32, 4  ;;  %v945_v42 = vadd.f32 %v941_v33, %v906_v19 }
 0x56b   : > { %v932_v36 = vpop.permute.xlu0 %931 }
 0x56c   : > { %v933_v38 = vsel %vm555_vm7, %v930_v35, %v932_v36  ;;  %v936_v39 = vsel %vm555_vm7, %v932_v36, 0.0  ;;  %v946_v43 = vadd.f32 %v942_v34, %v908_v20 }
 0x56d   : > { %v947_v40 = vsel %vm1629_vm9, %v933_v38, 0.0  ;;  %v948_v41 = vsel %vm1620_vm8, %v936_v39, 0.0 }
 0x56e   : > { %v951_v44 = vrot.slane %v947_v40, 4  ;;  %v952_v45 = vrot.slane %v948_v41, 4 }
 0x570   : > { %v955_v47 = vadd.f32 %v951_v44, %v945_v42  ;;  %v956_v48 = vadd.f32 %v952_v45, %v946_v43 }
 0x572   : > { %v965_v49 = vadd.f32 %v962_v46, %v956_v48  ;;  %v964_v50 = vadd.f32 %v962_v46, %v955_v47 }
 0x574   : > { %v967_v51 = vmul.f32 0.2, %v965_v49  ;;  %v966_v52 = vmul.f32 0.2, %v964_v50 }
 0x576   : > { %v969_v53 = vmax.f32 %v965_v49, %v967_v51  ;;  %v968_v54 = vmax.f32 %v964_v50, %v966_v52 }
 0x578   : > { %988 = vrot.lane.b32.xlu0 %v969_v53, %s1472_s23  ;;  %985 = vst [vmem:[#allocation2 + $0x48] sm:$0xf0] %v969_v53  ;;  %986 = vrot.lane.b32.xlu1 %v968_v54, %s1472_s23  ;;  %984 = vst [vmem:[#allocation2 + $0x10] sm:$0xf0] %v968_v54  ;;  %v973_v55 = vrot.slane %v969_v53, 4  ;;  %v972_v56 = vrot.slane %v968_v54, 4 }
 0x57c   : > { %976 = vrot.lane.b32.xlu1 %v973_v55, %s1473_s24  ;;  %974 = vrot.lane.b32.xlu0 %v972_v56, %s1473_s24 }
 0x580   : > { %1151 = vperm.xlu0 %1446, %v1148_v57  }
 0x5ea   : > { %v989_v58 = vpop.permute.xlu0 %988  ;;  %v987_v59 = vpop.permute.xlu1 %986 }
 0x5eb   : > { %v992_v60 = vsel %vm439_vm0, %v989_v58, 0.0  ;;  %v990_v61 = vsel %vm439_vm0, %v987_v59, %v989_v58 }
 0x5ec   : > { %v995_v62 = vrot.slane %v992_v60, 4  ;;  %v994_v63 = vrot.slane %v990_v61, 4 }
 0x5ee   : > { %999 = vst [vmem:[#allocation2 + $0x18] sm:$0xf] %v995_v62  ;;  %998 = vst [vmem:[#allocation2 + $0x30] sm:$0xf] %v994_v63  ;;  %v977_v5 = vpop.permute.xlu1 %976  ;;  %v975_v6 = vpop.permute.xlu0 %974  ;;  %v1335_v62 = vld [vmem:[%s1878_s10] sm:$0xff] }
 0x5ef   : > { %v978_v9 = vsel %vm426_vm1, %v975_v6, %v977_v5  ;;  %v981_v17 = vsel %vm426_vm1, 0.0, %v975_v6 }
 0x5f0   : > { %982 = vst [vmem:[#allocation2 + $0x10] sm:$0xf] %v981_v17  ;;  %983 = vst [vmem:[#allocation2 + $0x48] sm:$0xf] %v978_v9 }
 0x5f5   : > { %v1015_v18 = vld [vmem:[#allocation2 + $0x18] sm:$0xf]  ;;  %v1014_v19 = vld [vmem:[#allocation2 + $0x30] sm:$0xf] }
 0x5f6   : > { %1421 = vmatprep.subr.msk.mxu1 %vm650_vm10, %v1015_v18 }
 0x5f7   : > { %1422 = vmatpush1.msk.msra.mxu1 %vm650_vm10, %v1014_v19  ;;  %v1759_v20 = vld [vmem:[#allocation2 + $0x48] sm:$0xff]  ;;  %v1761_v21 = vld [vmem:[#allocation2 + $0x10] sm:$0xff] }
 0x5f8   : > { %1049 = vmatprep.subr.mxu1 %v1759_v20 }
 0x5f9   : > { %1050 = vmatpush1.msra.mxu1 %v1761_v21 }
 0x5fa   : > { %1051 = vmatprep.subr.mxu1 %v1699_v11 }
 0x5fb   : > { %1052 = vmatpush1.msra.mxu1 %v1701_v12  ;;  %v1152_v31 = vpop.permute.xlu0 %1151 }
 0x5fc   : > { %1053 = vmatprep.subr.mxu1 %v1705_v13  ;;  %v1153_v51 = vrot.slane %v1152_v31, 4 }
 0x5fd   : > { %1054 = vmatpush1.msra.mxu1 %v1708_v16 }
 0x5fe   : > { %1055 = vmatprep.subr.mxu1 %v1649_v14 }
 0x5ff   : > { %1056 = vmatpush1.msra.mxu1 %v1652_v15 }
 0x600   : > { %1457 = vmatprep.subr.msk.mxu1 %vm439_vm0, %v1567_v3 }
 0x601   : > { %1058 = vmatpush1.msra.mxu1 %v1579_v8 }
 0x602   : > { %1059 = vmatprep.subr.mxu1 %v1555_v1 }
 0x603   : > { %1060 = vmatpush1.msra.mxu1 %v1557_v2 }
 0x604   : > { %1061 = vmatprep.subr.mxu1 %v1575_v7 }
 0x605   : > { %1459 = vmatpush1.msk.msra.mxu1 %vm1589_vm3, %v1569_v4 }
 0x606   : > { %1423 = vmatmul.mubr.msk.f32.vlgmr.msra.gmra.mxu1 %vm1018_vm13, %v1016_v22 }
 0x607   : > { %1101 = vmatprep.mubr.f32.mxu1 %v1471_v0 }
 0x60a   : > { %1424 = vmatmul.mubr.msk.f32.gmra.mxu1 %vm1018_vm13, %v1017_v23 }
 0x6c6   : > { %v1097_v25 = vpop.f32.mrf.mxu1 }
 0x6c7   : > { %1110 = vrot.lane.b32.xlu0 %v1097_v25, %s1475_s29 }
 0x6c8   : > { %v1099_v27 = vpop.f32.mrf.mxu1 }
 0x6c9   : > { %1112 = vrot.lane.b32.xlu1 %v1099_v27, %s1475_s29 }
 0x6ca   : > { %v1103_v28 = vpop.f32.mrf.mxu1 }
 0x6cc   : > { %v1105_v29 = vpop.f32.mrf.mxu1 }
 0x6cd   : > { %1120 = vrot.lane.b32.xlu1 %v1103_v28, %s1476_s13  ;;  %1122 = vrot.lane.b32.xlu0 %v1105_v29, %s1476_s13 }
 0x739   : > { %v1111_v32 = vpop.permute.xlu0 %1110 }
 0x73a   : > { %v1117_v33 = vsel %vm544_vm4, 0.0, %v1111_v32 }
 0x73b   : > { %v1128_v34 = vsel %vm1612_vm6, %v1117_v33, 0.0  ;;  %v1113_v35 = vpop.permute.xlu1 %1112 }
 0x73c   : > { %v1114_v36 = vsel %vm544_vm4, %v1111_v32, %v1113_v35  ;;  %v1132_v39 = vrot.slane %v1128_v34, 4 }
 0x73d   : > { %v1129_v38 = vsel %vm1608_vm5, %v1114_v36, 0.0 }
 0x73e   : > { %v1133_v40 = vrot.slane %v1129_v38, 4  ;;  %v1136_v47 = vadd.f32 %v1132_v39, %v1097_v25 }
 0x73f   : > { %v1121_v41 = vpop.permute.xlu1 %1120  ;;  %v1123_v42 = vpop.permute.xlu0 %1122 }
 0x740   : > { %v1124_v43 = vsel %vm555_vm7, %v1121_v41, %v1123_v42  ;;  %v1127_v44 = vsel %vm555_vm7, %v1123_v42, 0.0  ;;  %v1137_v48 = vadd.f32 %v1133_v40, %v1099_v27 }
 0x741   : > { %v1138_v45 = vsel %vm1629_vm9, %v1124_v43, 0.0  ;;  %v1139_v46 = vsel %vm1620_vm8, %v1127_v44, 0.0 }
 0x742   : > { %v1142_v49 = vrot.slane %v1138_v45, 4  ;;  %v1143_v50 = vrot.slane %v1139_v46, 4 }
 0x744   : > { %v1146_v52 = vadd.f32 %v1142_v49, %v1136_v47  ;;  %v1147_v53 = vadd.f32 %v1143_v50, %v1137_v48 }
 0x746   : > { %v1155_v54 = vadd.f32 %v1153_v51, %v1146_v52  ;;  %v1156_v55 = vadd.f32 %v1153_v51, %v1147_v53 }
 0x748   : > { %v1158_v56 = vmul.f32 0.2, %v1156_v55  ;;  %v1157_v57 = vmul.f32 0.2, %v1155_v54 }
 0x74a   : > { %v1160_v58 = vmax.f32 %v1156_v55, %v1158_v56  ;;  %v1159_v59 = vmax.f32 %v1155_v54, %v1157_v57 }
 0x74c   : > { %v1164_v60 = vrot.slane %v1160_v58, 4  ;;  %v1163_v61 = vrot.slane %v1159_v59, 4 }
 0x74e   : > { %1167 = vrot.lane.b32.xlu0 %v1164_v60, %s1473_s24  ;;  %1182 = vst [vmem:[#allocation2 + $0x60] sm:$0xf] %v1164_v60  ;;  %1165 = vrot.lane.b32.xlu1 %v1163_v61, %s1473_s24  ;;  %1181 = vst [vmem:[#allocation2 + $0x68] sm:$0xf] %v1163_v61 }
 0x752   : > { %1183 = vrot.lane.b32.xlu0 %v1159_v59, %s1472_s23  ;;  %1185 = vrot.lane.b32.xlu1 %v1160_v58, %s1472_s23 }
 0x756   : > { %1338 = vperm.xlu1 %1447, %v1335_v62  }
 0x7c0   : > { %v1168_v63 = vpop.permute.xlu0 %1167  ;;  %v1166_v5 = vpop.permute.xlu1 %1165 }
 0x7c1   : > { %v1169_v6 = vsel %vm426_vm1, %v1166_v5, %v1168_v63  ;;  %v1171_v9 = vsel %vm426_vm1, 0.0, %v1166_v5 }
 0x7c2   : > { %v1173_v17 = vrot.slane %v1171_v9, 4  ;;  %v1174_v18 = vrot.slane %v1169_v6, 4 }
 0x7c4   : > { %1177 = vst [vmem:[#allocation2 + $0x30] sm:$0xf0] %v1173_v17  ;;  %1178 = vst [vmem:[#allocation2 + $0x18] sm:$0xf0] %v1174_v18  ;;  %v1184_v19 = vpop.permute.xlu0 %1183  ;;  %v1186_v22 = vpop.permute.xlu1 %1185 }
 0x7c5   : > { %v1187_v23 = vsel %vm439_vm0, %v1184_v19, %v1186_v22  ;;  %v1190_v25 = vsel %vm439_vm0, %v1186_v22, 0.0 }
 0x7c6   : > { %1191 = vst [vmem:[#allocation2 + $0x68] sm:$0xf0] %v1187_v23  ;;  %1192 = vst [vmem:[#allocation2 + $0x60] sm:$0xf0] %v1190_v25 }
 0x7cb   : > { %v1208_v29 = vld [vmem:[#allocation2 + $0x18] sm:$0xff]  ;;  %v1207_v31 = vld [vmem:[#allocation2 + $0x30] sm:$0xff] }
 0x7cd   : > { %v1210_v27 = vld [vmem:[#allocation2 + $0x60] sm:$0xff]  ;;  %v1209_v28 = vld [vmem:[#allocation2 + $0x68] sm:$0xff] }
 0x7ce   : > { %1238 = vmatprep.subr.mxu0 %v1210_v27 }
 0x7cf   : > { %1239 = vmatpush1.msra.mxu0 %v1209_v28 }
 0x7d0   : > { %1240 = vmatprep.subr.mxu0 %v1208_v29 }
 0x7d1   : > { %1241 = vmatpush1.msra.mxu0 %v1207_v31 }
 0x7d2   : > { %1242 = vmatprep.subr.mxu0 %v1759_v20 }
 0x7d3   : > { %1243 = vmatpush1.msra.mxu0 %v1761_v21 }
 0x7d4   : > { %1244 = vmatprep.subr.mxu0 %v1699_v11  ;;  %v1211_v11 = vld [vmem:[%s1877_s9] sm:$0xff] }
 0x7d5   : > { %1245 = vmatpush1.msra.mxu0 %v1701_v12 }
 0x7d6   : > { %1246 = vmatprep.subr.mxu0 %v1705_v13 }
 0x7d7   : > { %1247 = vmatpush1.msra.mxu0 %v1708_v16 }
 0x7d8   : > { %1248 = vmatprep.subr.mxu0 %v1649_v14 }
 0x7d9   : > { %1249 = vmatpush1.msra.mxu0 %v1652_v15 }
 0x7da   : > { %1460 = vmatprep.subr.msk.mxu0 %vm439_vm0, %v1567_v3  ;;  %v1212_v3 = vld [vmem:[%s1877_s9 + $0x8] sm:$0xff] }
 0x7db   : > { %1251 = vmatpush1.msra.mxu0 %v1579_v8  ;;  %v1213_v8 = vld [vmem:[%s1877_s9 + $0x10] sm:$0xff] }
 0x7dc   : > { %1252 = vmatprep.subr.mxu0 %v1555_v1 }
 0x7dd   : > { %1253 = vmatpush1.msra.mxu0 %v1557_v2 }
 0x7de   : > { %1254 = vmatprep.subr.mxu0 %v1575_v7 }
 0x7df   : > { %1462 = vmatpush1.msk.msra.mxu0 %vm1589_vm3, %v1569_v4 }
 0x7e0   : > { %1425 = vmatmul.mubr.msk.f32.vlgmr.msra.gmra.mxu0 %vm1214_vm14, %v1211_v11 }
 0x7e1   : > { %1294 = vmatprep.mubr.f32.mxu0 %v1471_v0 }
 0x7e4   : > { %1426 = vmatmul.mubr.msk.f32.gmra.mxu0 %vm1214_vm14, %v1212_v3 }
 0x7e5   : > { %1300 = vmatprep.mubr.f32.mxu0 %v1471_v0  ;;  %v1339_v0 = vpop.permute.xlu1 %1338 }
 0x7e8   : > { %1427 = vmatmul.mubr.msk.f32.gmra.mxu0 %vm1214_vm14, %v1213_v8 }
 0x8a0   : > { %v1290_v7 = vpop.f32.mrf.mxu0 }
 0x8a1   : > { %1309 = vrot.lane.b32.xlu1 %v1290_v7, %s1475_s29 }
 0x8a2   : > { %v1292_v10 = vpop.f32.mrf.mxu0 }
 0x8a3   : > { %1311 = vrot.lane.b32.xlu0 %v1292_v10, %s1475_s29 }
 0x8a4   : > { %v1296_v4 = vpop.f32.mrf.mxu0 }
 0x8a6   : > { %v1298_v14 = vpop.f32.mrf.mxu0 }
 0x8a8   : > { %v1302_v15 = vpop.f32.mrf.mxu0 }
 0x8a9   : > { %1319 = vrot.lane.b32.xlu0 %v1302_v15, %s1476_s13 }
 0x8aa   : > { %v1304_v12 = vpop.f32.mrf.mxu0 }
 0x8ab   : > { %1321 = vrot.lane.b32.xlu1 %v1304_v12, %s1476_s13 }
 0x913   : > { %v1310_v13 = vpop.permute.xlu1 %1309 }
 0x914   : > { %v1316_v20 = vsel %vm544_vm4, 0.0, %v1310_v13 }
 0x915   : > { %v1312_v16 = vpop.permute.xlu0 %1311  ;;  %v1327_v32 = vsel %vm1612_vm6, %v1316_v20, 0.0 }
 0x916   : > { %v1313_v21 = vsel %vm544_vm4, %v1310_v13, %v1312_v16  ;;  %v1329_v36 = vadd.f32 %v1327_v32, %v1296_v4 }
 0x917   : > { %v1328_v33 = vsel %vm1608_vm5, %v1313_v21, 0.0 }
 0x918   : > { %v1330_v38 = vadd.f32 %v1328_v33, %v1298_v14 }
 0x91b   : > { %v1320_v34 = vpop.permute.xlu0 %1319 }
 0x91d   : > { %v1322_v35 = vpop.permute.xlu1 %1321 }
 0x91e   : > { %v1323_v39 = vsel %vm555_vm7, %v1320_v34, %v1322_v35  ;;  %v1326_v40 = vsel %vm555_vm7, %v1322_v35, 0.0 }
 0x91f   : > { %v1331_v41 = vsel %vm1629_vm9, %v1323_v39, 0.0  ;;  %v1332_v42 = vsel %vm1620_vm8, %v1326_v40, 0.0 }
 0x920   : > { %v1333_v26 = vadd.f32 %v1331_v41, %v1329_v36  ;;  %v1334_v43 = vadd.f32 %v1332_v42, %v1330_v38 }
 0x922   : > { %v1341_v44 = vadd.f32 %v1339_v0, %v1333_v26  ;;  %v1342_v24 = vadd.f32 %v1339_v0, %v1334_v43 }
 0x924   : > { %v1343_v45 = vmul.f32 0.2, %v1341_v44  ;;  %v1344_v46 = vmul.f32 0.2, %v1342_v24 }
 0x926   : > { %v1345_v47 = vadd.f32 %v1343_v45, %v1557_v2  ;;  %v1346_v48 = vadd.f32 %v1344_v46, %v1555_v1 }
 0x928   : > { %1347 = vst [vmem:[%s386_s14] sm:$0xff] %v1345_v47  ;;  %1348 = vst [vmem:[%s386_s14 + $0x8] sm:$0xff] %v1346_v48 }
 0x929 PF: > { %s21_s17 = sadd.s32 1, %s1469_s17  }
 0x92a   : > { %p18_p4 = scmp.ge.s32.totalorder %s21_s17, 4  }
 0x92c   :  { %20 = sbr.rel (!%p18_p4) target bundleno = 1 (0x1), region = 94 }

</bundles_post_ra>
